<compile_context>
chip_gen: v6e
topology: v6e:2x2x1
jax: 0.10.0
libtpu: 0.0.40
codegen_flags: <defaults>
</compile_context>

<pallas_src>
import functools

import jax
import jax.numpy as jnp
from jax import lax
from jax.experimental import pallas as pl
from jax.experimental.pallas import tpu as pltpu


# ----------------------------- fused MHA kernel -----------------------------
def _fused_mha_kernel(xq_ref, xkv_ref, wq_ref, wk_ref, wv_ref, pw_ref, pb_ref,
                      o_ref, *, num_heads, head_size, q_block, approx_recip):
    # xq_ref : (1, tq, C)   query rows of this (batch, q-tile) grid point (compute dtype)
    # xkv_ref: (1, T,  C)   full sequence for K/V of this batch element (compute dtype)
    # wq_ref : (C, H*hs)    fused per-head Wq, softmax scale pre-folded (compute dtype)
    # wk_ref : (C, H*hs)    fused per-head Wk (compute dtype)
    # wv_ref : (C, H*hs)    fused per-head Wv (compute dtype)
    # pw_ref : (H, hs, C)   output projection weight, head-major (compute dtype)
    # pb_ref : (1, C)       output projection bias (f32)
    # o_ref  : (1, tq, C)   module output
    H, hs = num_heads, head_size
    cd = wq_ref.dtype

    xq = xq_ref[0]                      # (tq, C)
    xkv = xkv_ref[0]                    # (T, C)
    tq = xq.shape[0]
    T = xkv.shape[0]
    C_out = o_ref.shape[-1]

    # ---- fused projections (weights already compute-dtype; scale folded into Wq) ----
    q = jnp.dot(xq, wq_ref[...], preferred_element_type=jnp.float32).astype(cd)   # (tq, H*hs)
    k = jnp.dot(xkv, wk_ref[...], preferred_element_type=jnp.float32).astype(cd)  # (T,  H*hs)
    v = jnp.dot(xkv, wv_ref[...], preferred_element_type=jnp.float32).astype(cd)  # (T,  H*hs)

    # ---- causal mask for this query tile (global row offset of the tile) ----
    q0 = pl.program_id(1) * q_block
    row = lax.broadcasted_iota(jnp.int32, (tq, T), 0) + q0
    col = lax.broadcasted_iota(jnp.int32, (tq, T), 1)
    causal = col <= row

    # ---- per-head attention; output projection accumulated head-by-head ----
    #   concat(head_0..head_{H-1}) @ P  ==  sum_h  head_h @ P[h]
    # TODO(synk): replace the static unroll with lax.fori_loop / a head grid axis to bound
    #             per-head live ranges for large T on v7x (64 MiB VMEM).
    acc = jnp.zeros((tq, C_out), jnp.float32)
    for h in range(H):
        sl = slice(h * hs, (h + 1) * hs)
        qh = q[:, sl]                                        # (tq, hs)
        kh = k[:, sl]                                        # (T,  hs)
        vh = v[:, sl]                                        # (T,  hs)

        # scores = q @ k^T (scale already folded into Wq); contract last dims, f32 acc.
        s = lax.dot_general(qh, kh, (((1,), (1,)), ((), ())),
                            preferred_element_type=jnp.float32)          # (tq, T) f32
        s = jnp.where(causal, s, -jnp.inf)

        # softmax along the key axis (f32); divide via reciprocal (EUP slot in bf16 mode).
        m = jnp.max(s, axis=-1, keepdims=True)
        e = jnp.exp(s - m)
        denom = jnp.sum(e, axis=-1, keepdims=True)
        p = e * pl.reciprocal(denom, approx=approx_recip)
        # TODO(synk): attention-weight dropout omitted (inference / p=0.0 semantics).

        oh = jnp.dot(p.astype(cd), vh, preferred_element_type=jnp.float32)        # (tq, hs) f32
        acc = acc + jnp.dot(oh.astype(cd), pw_ref[h],
                            preferred_element_type=jnp.float32)                   # (tq, C_out)

    y = acc + pb_ref[...].astype(jnp.float32)               # bias broadcast (1,C)->(tq,C)
    o_ref[0] = y.astype(o_ref.dtype)


def _pick_q_block(T):
    for cand in (512, 256, 128):
        if T % cand == 0:
            return cand
    return T


def multi_head_attention(x, params, *, compute_dtype=jnp.bfloat16):
    """Equivalent of MultiHeadAttention.forward. x: (B, T, C) -> (B, T, C).

    params:
      wq, wk, wv : (H, C, hs)  per-head projection matrices (x @ W form, bias-free)
      proj_w_t   : (H*hs, C)   output projection weight, transposed to (in, out)
      proj_b     : (C,)        output projection bias
    """
    wq, wk, wv = params["wq"], params["wk"], params["wv"]
    B, T, C = x.shape
    H, _, hs = wq.shape
    HS = H * hs
    proj_w_t = params["proj_w_t"]
    C_out = proj_w_t.shape[1]
    scale = float(C) ** (-0.5)          # embedding-dim scaling, exactly as in the module
    cd = jnp.dtype(compute_dtype)
    approx_recip = cd == jnp.dtype(jnp.bfloat16)

    # ---- weight prep (outside the kernel, done once) ----
    # Column block h*hs:(h+1)*hs of each fused matrix holds head h's weights.
    wq_s = (jnp.transpose(wq, (1, 0, 2)).reshape(C, HS) * scale).astype(cd)   # scale folded
    wk_c = jnp.transpose(wk, (1, 0, 2)).reshape(C, HS).astype(cd)
    wv_c = jnp.transpose(wv, (1, 0, 2)).reshape(C, HS).astype(cd)
    pw_h = proj_w_t.reshape(H, hs, C_out).astype(cd)                          # head-major proj
    pb2 = params["proj_b"].reshape(1, C_out).astype(jnp.float32)
    x_c = x.astype(cd)

    tq = _pick_q_block(T)
    n_q = T // tq

    kernel = functools.partial(_fused_mha_kernel, num_heads=H, head_size=hs,
                               q_block=tq, approx_recip=approx_recip)

    w_isz = cd.itemsize
    cost = pl.CostEstimate(
        flops=(2 * B * T * C * HS                       # Q projection
               + 2 * (2 * B * n_q * T * C * HS)         # K, V projections (per q-tile)
               + 4 * B * H * T * T * hs                 # QK^T and PV
               + 2 * B * T * HS * C_out),               # output projection
        transcendentals=B * H * T * T,
        bytes_accessed=(B * (T + n_q * T) * C * w_isz                    # x (q + kv paths)
                        + (3 * C * HS + HS * C_out) * w_isz + 4 * C_out  # weights + bias
                        + B * T * C_out * x.dtype.itemsize),             # output
    )

    return pl.pallas_call(
        kernel,
        out_shape=jax.ShapeDtypeStruct((B, T, C_out), x.dtype),
        grid_spec=pltpu.PrefetchScalarGridSpec(
            num_scalar_prefetch=0,
            grid=(B, n_q),
            in_specs=[
                pl.BlockSpec((1, tq, C), lambda b, qi: (b, qi, 0)),       # x rows for this q tile
                pl.BlockSpec((1, T, C), lambda b, qi: (b, 0, 0)),         # full-seq x for K/V
                pl.BlockSpec((C, HS), lambda b, qi: (0, 0)),              # Wq (scaled, resident)
                pl.BlockSpec((C, HS), lambda b, qi: (0, 0)),              # Wk (resident)
                pl.BlockSpec((C, HS), lambda b, qi: (0, 0)),              # Wv (resident)
                pl.BlockSpec((H, hs, C_out), lambda b, qi: (0, 0, 0)),    # proj weight, head-major
                pl.BlockSpec((1, C_out), lambda b, qi: (0, 0)),           # proj bias (f32)
            ],
            out_specs=pl.BlockSpec((1, tq, C_out), lambda b, qi: (b, qi, 0)),
        ),
        compiler_params=pltpu.CompilerParams(
            dimension_semantics=("parallel", "parallel"),
            vmem_limit_bytes=32 * 1024 * 1024,
        ),
        cost_estimate=cost,
    )(x_c, x_c, wq_s, wk_c, wv_c, pw_h, pb2)


# ----------------------------- pure-JAX reference -----------------------------
def reference(x, params):
    wq, wk, wv = params["wq"], params["wk"], params["wv"]
    B, T, C = x.shape
    H, _, hs = wq.shape
    scale = C ** (-0.5)
    q = jnp.einsum("btc,hcd->bhtd", x, wq)
    k = jnp.einsum("btc,hcd->bhtd", x, wk)
    v = jnp.einsum("btc,hcd->bhtd", x, wv)
    s = jnp.einsum("bhqd,bhkd->bhqk", q, k) * scale
    mask = jnp.tril(jnp.ones((T, T), bool))
    s = jnp.where(mask, s, -jnp.inf)
    w = jax.nn.softmax(s, axis=-1)
    o = jnp.einsum("bhqk,bhkd->bhqd", w, v)
    concat = jnp.transpose(o, (0, 2, 1, 3)).reshape(B, T, H * hs)
    return concat @ params["proj_w_t"] + params["proj_b"]


if __name__ == "__main__":
    # Small shapes consistent with the module: num_heads * head_size == num_embeddings
    B, T = 2, 8            # batch, block_size (context length)
    C = 32                 # num_embeddings
    H, hs = 4, 8           # num_heads, head_size (H * hs == C)

    key = jax.random.PRNGKey(0)
    k_x, k_q, k_k, k_v, k_pw, k_pb = jax.random.split(key, 6)

    x = jax.random.normal(k_x, (B, T, C), dtype=jnp.float32)
    params = {
        "wq": jax.random.normal(k_q, (H, C, hs), dtype=jnp.float32) * 0.1,
        "wk": jax.random.normal(k_k, (H, C, hs), dtype=jnp.float32) * 0.1,
        "wv": jax.random.normal(k_v, (H, C, hs), dtype=jnp.float32) * 0.1,
        # nn.Linear(C, C): weight (C_out, C_in) applied as x @ W^T; store transposed (C_in, C_out)
        "proj_w_t": jax.random.normal(k_pw, (C, C), dtype=jnp.float32) * 0.1,
        "proj_b": jax.random.normal(k_pb, (C,), dtype=jnp.float32) * 0.1,
    }

    ref = reference(x, params)

    # f32 compute path: exact reciprocal, tight check.
    out_f32 = jax.block_until_ready(multi_head_attention(x, params, compute_dtype=jnp.float32))
    assert out_f32.shape == (B, T, C)
    assert jnp.allclose(out_f32, ref, atol=5e-3, rtol=5e-3), (
        f"f32 max abs err {jnp.max(jnp.abs(out_f32 - ref))}"
    )

    # bf16 compute path (the performance configuration): looser tolerance.
    out_bf16 = jax.block_until_ready(multi_head_attention(x, params, compute_dtype=jnp.bfloat16))
    assert out_bf16.shape == (B, T, C)
    assert jnp.allclose(out_bf16, ref, atol=5e-2, rtol=5e-2), (
        f"bf16 max abs err {jnp.max(jnp.abs(out_bf16 - ref))}"
    )

    print("KERNEL_OK")
</pallas_src>

<mosaic_0001>
module attributes {stable_mosaic.version = 11 : i64} {
  func.func @_fused_mha_kernel(%arg0: i32, %arg1: i32, %arg2: memref<1x8x32xf32, #tpu.memory_space<vmem>>, %arg3: memref<1x8x32xf32, #tpu.memory_space<vmem>>, %arg4: memref<32x32xf32, #tpu.memory_space<vmem>>, %arg5: memref<32x32xf32, #tpu.memory_space<vmem>>, %arg6: memref<32x32xf32, #tpu.memory_space<vmem>>, %arg7: memref<4x8x32xf32, #tpu.memory_space<vmem>>, %arg8: memref<1x32xf32, #tpu.memory_space<vmem>>, %arg9: memref<1x8x32xf32, #tpu.memory_space<vmem>>) attributes {dimension_semantics = [#tpu.dimension_semantics<parallel>, #tpu.dimension_semantics<parallel>], iteration_bounds = array<i64: 2, 1>, scalar_prefetch = 0 : i64, scratch_operands = 0 : i64, tpu.core_type = #tpu.core_type<tc>, window_params = [{transform_indices = @transform_0, window_bounds = array<i64: 1, 8, 32>}, {transform_indices = @transform_1, window_bounds = array<i64: 1, 8, 32>}, {pipeline_mode = #tpu.pipeline_mode<synchronous>, transform_indices = @transform_2, window_bounds = array<i64: 32, 32>}, {pipeline_mode = #tpu.pipeline_mode<synchronous>, transform_indices = @transform_3, window_bounds = array<i64: 32, 32>}, {pipeline_mode = #tpu.pipeline_mode<synchronous>, transform_indices = @transform_4, window_bounds = array<i64: 32, 32>}, {pipeline_mode = #tpu.pipeline_mode<synchronous>, transform_indices = @transform_5, window_bounds = array<i64: 4, 8, 32>}, {pipeline_mode = #tpu.pipeline_mode<synchronous>, transform_indices = @transform_6, window_bounds = array<i64: 1, 32>}, {transform_indices = @transform_7, window_bounds = array<i64: 1, 8, 32>}]} {
    %c0 = arith.constant 0 : index
    %c0_0 = arith.constant 0 : index
    %c0_1 = arith.constant 0 : index
    %0 = vector.load %arg2[%c0, %c0_0, %c0_1] : memref<1x8x32xf32, #tpu.memory_space<vmem>>, vector<1x8x32xf32>
    %1 = vector.shape_cast %0 : vector<1x8x32xf32> to vector<8x32xf32>
    %c0_2 = arith.constant 0 : index
    %c0_3 = arith.constant 0 : index
    %c0_4 = arith.constant 0 : index
    %2 = vector.load %arg3[%c0_2, %c0_3, %c0_4] : memref<1x8x32xf32, #tpu.memory_space<vmem>>, vector<1x8x32xf32>
    %3 = vector.shape_cast %2 : vector<1x8x32xf32> to vector<8x32xf32>
    %c0_5 = arith.constant 0 : index
    %c0_6 = arith.constant 0 : index
    %4 = vector.load %arg4[%c0_5, %c0_6] : memref<32x32xf32, #tpu.memory_space<vmem>>, vector<32x32xf32>
    %cst = arith.constant dense<0.000000e+00> : vector<8x32xf32>
    %5 = tpu.matmul %1, %4, %cst {dimension_numbers = #tpu.dot_dimension_numbers<[1], [0], [0], [1], [0, 0, 1, 1], [], []>} : vector<8x32xf32>, vector<32x32xf32>, vector<8x32xf32> -> vector<8x32xf32>
    %c0_7 = arith.constant 0 : index
    %c0_8 = arith.constant 0 : index
    %6 = vector.load %arg5[%c0_7, %c0_8] : memref<32x32xf32, #tpu.memory_space<vmem>>, vector<32x32xf32>
    %cst_9 = arith.constant dense<0.000000e+00> : vector<8x32xf32>
    %7 = tpu.matmul %3, %6, %cst_9 {dimension_numbers = #tpu.dot_dimension_numbers<[1], [0], [0], [1], [0, 0, 1, 1], [], []>} : vector<8x32xf32>, vector<32x32xf32>, vector<8x32xf32> -> vector<8x32xf32>
    %c0_10 = arith.constant 0 : index
    %c0_11 = arith.constant 0 : index
    %8 = vector.load %arg6[%c0_10, %c0_11] : memref<32x32xf32, #tpu.memory_space<vmem>>, vector<32x32xf32>
    %cst_12 = arith.constant dense<0.000000e+00> : vector<8x32xf32>
    %9 = tpu.matmul %3, %8, %cst_12 {dimension_numbers = #tpu.dot_dimension_numbers<[1], [0], [0], [1], [0, 0, 1, 1], [], []>} : vector<8x32xf32>, vector<32x32xf32>, vector<8x32xf32> -> vector<8x32xf32>
    %c8_i32 = arith.constant 8 : i32
    %10 = arith.muli %arg1, %c8_i32 : i32
    %11 = tpu.iota {dimensions = array<i32: 0>} : vector<8x8xi32>
    %12 = vector.broadcast %10 : i32 to vector<8x8xi32>
    %13 = arith.addi %11, %12 : vector<8x8xi32>
    %14 = tpu.iota {dimensions = array<i32: 1>} : vector<8x8xi32>
    %15 = arith.cmpi sle, %14, %13 : vector<8x8xi32>
    %cst_13 = arith.constant 0.000000e+00 : f32
    %16 = vector.broadcast %cst_13 : f32 to vector<8x32xf32>
    %17 = vector.extract_strided_slice %5 {offsets = [0, 0], sizes = [8, 8], strides = [1, 1]} : vector<8x32xf32> to vector<8x8xf32>
    %18 = vector.extract_strided_slice %7 {offsets = [0, 0], sizes = [8, 8], strides = [1, 1]} : vector<8x32xf32> to vector<8x8xf32>
    %19 = vector.extract_strided_slice %9 {offsets = [0, 0], sizes = [8, 8], strides = [1, 1]} : vector<8x32xf32> to vector<8x8xf32>
    %cst_14 = arith.constant dense<0.000000e+00> : vector<8x8xf32>
    %20 = tpu.matmul %17, %18, %cst_14 {dimension_numbers = #tpu.dot_dimension_numbers<[1], [1], [0], [0], [0, 0, 1, 0], [], []>} : vector<8x8xf32>, vector<8x8xf32>, vector<8x8xf32> -> vector<8x8xf32>
    %cst_15 = arith.constant 0xFF800000 : f32
    %21 = vector.broadcast %cst_15 : f32 to vector<8x8xf32>
    %22 = arith.select %15, %20, %21 : vector<8x8xi1>, vector<8x8xf32>
    %cst_16 = arith.constant dense<0xFF800000> : vector<8xf32>
    %23 = vector.multi_reduction <maximumf>, %22, %cst_16 [1] : vector<8x8xf32> to vector<8xf32>
    %24 = vector.shape_cast %23 : vector<8xf32> to vector<8x1xf32>
    %25 = vector.broadcast %24 : vector<8x1xf32> to vector<8x8xf32>
    %26 = arith.subf %22, %25 : vector<8x8xf32>
    %27 = math.exp %26 : vector<8x8xf32>
    %cst_17 = arith.constant dense<0.000000e+00> : vector<8xf32>
    %28 = vector.multi_reduction <add>, %27, %cst_17 [1] : vector<8x8xf32> to vector<8xf32>
    %29 = vector.shape_cast %28 : vector<8xf32> to vector<8x1xf32>
    %30 = tpu.reciprocal %29 : vector<8x1xf32> -> vector<8x1xf32>
    %31 = vector.broadcast %30 : vector<8x1xf32> to vector<8x8xf32>
    %32 = arith.mulf %27, %31 : vector<8x8xf32>
    %cst_18 = arith.constant dense<0.000000e+00> : vector<8x8xf32>
    %33 = tpu.matmul %32, %19, %cst_18 {dimension_numbers = #tpu.dot_dimension_numbers<[1], [0], [0], [1], [0, 0, 1, 1], [], []>} : vector<8x8xf32>, vector<8x8xf32>, vector<8x8xf32> -> vector<8x8xf32>
    %c0_19 = arith.constant 0 : index
    %c0_20 = arith.constant 0 : index
    %c0_21 = arith.constant 0 : index
    %34 = vector.load %arg7[%c0_19, %c0_20, %c0_21] : memref<4x8x32xf32, #tpu.memory_space<vmem>>, vector<1x8x32xf32>
    %35 = vector.shape_cast %34 : vector<1x8x32xf32> to vector<8x32xf32>
    %cst_22 = arith.constant dense<0.000000e+00> : vector<8x32xf32>
    %36 = tpu.matmul %33, %35, %cst_22 {dimension_numbers = #tpu.dot_dimension_numbers<[1], [0], [0], [1], [0, 0, 1, 1], [], []>} : vector<8x8xf32>, vector<8x32xf32>, vector<8x32xf32> -> vector<8x32xf32>
    %37 = arith.addf %16, %36 : vector<8x32xf32>
    %38 = vector.extract_strided_slice %5 {offsets = [0, 8], sizes = [8, 8], strides = [1, 1]} : vector<8x32xf32> to vector<8x8xf32>
    %39 = vector.extract_strided_slice %7 {offsets = [0, 8], sizes = [8, 8], strides = [1, 1]} : vector<8x32xf32> to vector<8x8xf32>
    %40 = vector.extract_strided_slice %9 {offsets = [0, 8], sizes = [8, 8], strides = [1, 1]} : vector<8x32xf32> to vector<8x8xf32>
    %cst_23 = arith.constant dense<0.000000e+00> : vector<8x8xf32>
    %41 = tpu.matmul %38, %39, %cst_23 {dimension_numbers = #tpu.dot_dimension_numbers<[1], [1], [0], [0], [0, 0, 1, 0], [], []>} : vector<8x8xf32>, vector<8x8xf32>, vector<8x8xf32> -> vector<8x8xf32>
    %cst_24 = arith.constant 0xFF800000 : f32
    %42 = vector.broadcast %cst_24 : f32 to vector<8x8xf32>
    %43 = arith.select %15, %41, %42 : vector<8x8xi1>, vector<8x8xf32>
    %cst_25 = arith.constant dense<0xFF800000> : vector<8xf32>
    %44 = vector.multi_reduction <maximumf>, %43, %cst_25 [1] : vector<8x8xf32> to vector<8xf32>
    %45 = vector.shape_cast %44 : vector<8xf32> to vector<8x1xf32>
    %46 = vector.broadcast %45 : vector<8x1xf32> to vector<8x8xf32>
    %47 = arith.subf %43, %46 : vector<8x8xf32>
    %48 = math.exp %47 : vector<8x8xf32>
    %cst_26 = arith.constant dense<0.000000e+00> : vector<8xf32>
    %49 = vector.multi_reduction <add>, %48, %cst_26 [1] : vector<8x8xf32> to vector<8xf32>
    %50 = vector.shape_cast %49 : vector<8xf32> to vector<8x1xf32>
    %51 = tpu.reciprocal %50 : vector<8x1xf32> -> vector<8x1xf32>
    %52 = vector.broadcast %51 : vector<8x1xf32> to vector<8x8xf32>
    %53 = arith.mulf %48, %52 : vector<8x8xf32>
    %cst_27 = arith.constant dense<0.000000e+00> : vector<8x8xf32>
    %54 = tpu.matmul %53, %40, %cst_27 {dimension_numbers = #tpu.dot_dimension_numbers<[1], [0], [0], [1], [0, 0, 1, 1], [], []>} : vector<8x8xf32>, vector<8x8xf32>, vector<8x8xf32> -> vector<8x8xf32>
    %c1 = arith.constant 1 : index
    %c0_28 = arith.constant 0 : index
    %c0_29 = arith.constant 0 : index
    %55 = vector.load %arg7[%c1, %c0_28, %c0_29] : memref<4x8x32xf32, #tpu.memory_space<vmem>>, vector<1x8x32xf32>
    %56 = vector.shape_cast %55 : vector<1x8x32xf32> to vector<8x32xf32>
    %cst_30 = arith.constant dense<0.000000e+00> : vector<8x32xf32>
    %57 = tpu.matmul %54, %56, %cst_30 {dimension_numbers = #tpu.dot_dimension_numbers<[1], [0], [0], [1], [0, 0, 1, 1], [], []>} : vector<8x8xf32>, vector<8x32xf32>, vector<8x32xf32> -> vector<8x32xf32>
    %58 = arith.addf %37, %57 : vector<8x32xf32>
    %59 = vector.extract_strided_slice %5 {offsets = [0, 16], sizes = [8, 8], strides = [1, 1]} : vector<8x32xf32> to vector<8x8xf32>
    %60 = vector.extract_strided_slice %7 {offsets = [0, 16], sizes = [8, 8], strides = [1, 1]} : vector<8x32xf32> to vector<8x8xf32>
    %61 = vector.extract_strided_slice %9 {offsets = [0, 16], sizes = [8, 8], strides = [1, 1]} : vector<8x32xf32> to vector<8x8xf32>
    %cst_31 = arith.constant dense<0.000000e+00> : vector<8x8xf32>
    %62 = tpu.matmul %59, %60, %cst_31 {dimension_numbers = #tpu.dot_dimension_numbers<[1], [1], [0], [0], [0, 0, 1, 0], [], []>} : vector<8x8xf32>, vector<8x8xf32>, vector<8x8xf32> -> vector<8x8xf32>
    %cst_32 = arith.constant 0xFF800000 : f32
    %63 = vector.broadcast %cst_32 : f32 to vector<8x8xf32>
    %64 = arith.select %15, %62, %63 : vector<8x8xi1>, vector<8x8xf32>
    %cst_33 = arith.constant dense<0xFF800000> : vector<8xf32>
    %65 = vector.multi_reduction <maximumf>, %64, %cst_33 [1] : vector<8x8xf32> to vector<8xf32>
    %66 = vector.shape_cast %65 : vector<8xf32> to vector<8x1xf32>
    %67 = vector.broadcast %66 : vector<8x1xf32> to vector<8x8xf32>
    %68 = arith.subf %64, %67 : vector<8x8xf32>
    %69 = math.exp %68 : vector<8x8xf32>
    %cst_34 = arith.constant dense<0.000000e+00> : vector<8xf32>
    %70 = vector.multi_reduction <add>, %69, %cst_34 [1] : vector<8x8xf32> to vector<8xf32>
    %71 = vector.shape_cast %70 : vector<8xf32> to vector<8x1xf32>
    %72 = tpu.reciprocal %71 : vector<8x1xf32> -> vector<8x1xf32>
    %73 = vector.broadcast %72 : vector<8x1xf32> to vector<8x8xf32>
    %74 = arith.mulf %69, %73 : vector<8x8xf32>
    %cst_35 = arith.constant dense<0.000000e+00> : vector<8x8xf32>
    %75 = tpu.matmul %74, %61, %cst_35 {dimension_numbers = #tpu.dot_dimension_numbers<[1], [0], [0], [1], [0, 0, 1, 1], [], []>} : vector<8x8xf32>, vector<8x8xf32>, vector<8x8xf32> -> vector<8x8xf32>
    %c2 = arith.constant 2 : index
    %c0_36 = arith.constant 0 : index
    %c0_37 = arith.constant 0 : index
    %76 = vector.load %arg7[%c2, %c0_36, %c0_37] : memref<4x8x32xf32, #tpu.memory_space<vmem>>, vector<1x8x32xf32>
    %77 = vector.shape_cast %76 : vector<1x8x32xf32> to vector<8x32xf32>
    %cst_38 = arith.constant dense<0.000000e+00> : vector<8x32xf32>
    %78 = tpu.matmul %75, %77, %cst_38 {dimension_numbers = #tpu.dot_dimension_numbers<[1], [0], [0], [1], [0, 0, 1, 1], [], []>} : vector<8x8xf32>, vector<8x32xf32>, vector<8x32xf32> -> vector<8x32xf32>
    %79 = arith.addf %58, %78 : vector<8x32xf32>
    %80 = vector.extract_strided_slice %5 {offsets = [0, 24], sizes = [8, 8], strides = [1, 1]} : vector<8x32xf32> to vector<8x8xf32>
    %81 = vector.extract_strided_slice %7 {offsets = [0, 24], sizes = [8, 8], strides = [1, 1]} : vector<8x32xf32> to vector<8x8xf32>
    %82 = vector.extract_strided_slice %9 {offsets = [0, 24], sizes = [8, 8], strides = [1, 1]} : vector<8x32xf32> to vector<8x8xf32>
    %cst_39 = arith.constant dense<0.000000e+00> : vector<8x8xf32>
    %83 = tpu.matmul %80, %81, %cst_39 {dimension_numbers = #tpu.dot_dimension_numbers<[1], [1], [0], [0], [0, 0, 1, 0], [], []>} : vector<8x8xf32>, vector<8x8xf32>, vector<8x8xf32> -> vector<8x8xf32>
    %cst_40 = arith.constant 0xFF800000 : f32
    %84 = vector.broadcast %cst_40 : f32 to vector<8x8xf32>
    %85 = arith.select %15, %83, %84 : vector<8x8xi1>, vector<8x8xf32>
    %cst_41 = arith.constant dense<0xFF800000> : vector<8xf32>
    %86 = vector.multi_reduction <maximumf>, %85, %cst_41 [1] : vector<8x8xf32> to vector<8xf32>
    %87 = vector.shape_cast %86 : vector<8xf32> to vector<8x1xf32>
    %88 = vector.broadcast %87 : vector<8x1xf32> to vector<8x8xf32>
    %89 = arith.subf %85, %88 : vector<8x8xf32>
    %90 = math.exp %89 : vector<8x8xf32>
    %cst_42 = arith.constant dense<0.000000e+00> : vector<8xf32>
    %91 = vector.multi_reduction <add>, %90, %cst_42 [1] : vector<8x8xf32> to vector<8xf32>
    %92 = vector.shape_cast %91 : vector<8xf32> to vector<8x1xf32>
    %93 = tpu.reciprocal %92 : vector<8x1xf32> -> vector<8x1xf32>
    %94 = vector.broadcast %93 : vector<8x1xf32> to vector<8x8xf32>
    %95 = arith.mulf %90, %94 : vector<8x8xf32>
    %cst_43 = arith.constant dense<0.000000e+00> : vector<8x8xf32>
    %96 = tpu.matmul %95, %82, %cst_43 {dimension_numbers = #tpu.dot_dimension_numbers<[1], [0], [0], [1], [0, 0, 1, 1], [], []>} : vector<8x8xf32>, vector<8x8xf32>, vector<8x8xf32> -> vector<8x8xf32>
    %c3 = arith.constant 3 : index
    %c0_44 = arith.constant 0 : index
    %c0_45 = arith.constant 0 : index
    %97 = vector.load %arg7[%c3, %c0_44, %c0_45] : memref<4x8x32xf32, #tpu.memory_space<vmem>>, vector<1x8x32xf32>
    %98 = vector.shape_cast %97 : vector<1x8x32xf32> to vector<8x32xf32>
    %cst_46 = arith.constant dense<0.000000e+00> : vector<8x32xf32>
    %99 = tpu.matmul %96, %98, %cst_46 {dimension_numbers = #tpu.dot_dimension_numbers<[1], [0], [0], [1], [0, 0, 1, 1], [], []>} : vector<8x8xf32>, vector<8x32xf32>, vector<8x32xf32> -> vector<8x32xf32>
    %100 = arith.addf %79, %99 : vector<8x32xf32>
    %c0_47 = arith.constant 0 : index
    %c0_48 = arith.constant 0 : index
    %101 = vector.load %arg8[%c0_47, %c0_48] : memref<1x32xf32, #tpu.memory_space<vmem>>, vector<1x32xf32>
    %102 = vector.broadcast %101 : vector<1x32xf32> to vector<8x32xf32>
    %103 = arith.addf %100, %102 : vector<8x32xf32>
    %c0_49 = arith.constant 0 : index
    %c0_50 = arith.constant 0 : index
    %c0_51 = arith.constant 0 : index
    %104 = vector.load %arg9[%c0_49, %c0_50, %c0_51] : memref<1x8x32xf32, #tpu.memory_space<vmem>>, vector<1x8x32xf32>
    %105 = vector.shape_cast %104 : vector<1x8x32xf32> to vector<8x32xf32>
    %106 = vector.shape_cast %103 : vector<8x32xf32> to vector<1x8x32xf32>
    tpu.vector_store %arg9[%c0_49, %c0_50, %c0_51], %106 {strides = array<i32>} : memref<1x8x32xf32, #tpu.memory_space<vmem>>, vector<1x8x32xf32>,
    return
  }
  func.func @transform_0(%arg0: i32, %arg1: i32) -> (i32, i32, i32) {
    %c0_i32 = arith.constant 0 : i32
    %c0_i32_0 = arith.constant 0 : i32
    return %arg0, %arg1, %c0_i32 : i32, i32, i32
  }
  func.func @transform_1(%arg0: i32, %arg1: i32) -> (i32, i32, i32) {
    %c0_i32 = arith.constant 0 : i32
    %c0_i32_0 = arith.constant 0 : i32
    %c0_i32_1 = arith.constant 0 : i32
    return %arg0, %c0_i32, %c0_i32_0 : i32, i32, i32
  }
  func.func @transform_2(%arg0: i32, %arg1: i32) -> (i32, i32) {
    %c0_i32 = arith.constant 0 : i32
    %c0_i32_0 = arith.constant 0 : i32
    %c0_i32_1 = arith.constant 0 : i32
    return %c0_i32, %c0_i32_0 : i32, i32
  }
  func.func @transform_3(%arg0: i32, %arg1: i32) -> (i32, i32) {
    %c0_i32 = arith.constant 0 : i32
    %c0_i32_0 = arith.constant 0 : i32
    %c0_i32_1 = arith.constant 0 : i32
    return %c0_i32, %c0_i32_0 : i32, i32
  }
  func.func @transform_4(%arg0: i32, %arg1: i32) -> (i32, i32) {
    %c0_i32 = arith.constant 0 : i32
    %c0_i32_0 = arith.constant 0 : i32
    %c0_i32_1 = arith.constant 0 : i32
    return %c0_i32, %c0_i32_0 : i32, i32
  }
  func.func @transform_5(%arg0: i32, %arg1: i32) -> (i32, i32, i32) {
    %c0_i32 = arith.constant 0 : i32
    %c0_i32_0 = arith.constant 0 : i32
    %c0_i32_1 = arith.constant 0 : i32
    %c0_i32_2 = arith.constant 0 : i32
    return %c0_i32, %c0_i32_0, %c0_i32_1 : i32, i32, i32
  }
  func.func @transform_6(%arg0: i32, %arg1: i32) -> (i32, i32) {
    %c0_i32 = arith.constant 0 : i32
    %c0_i32_0 = arith.constant 0 : i32
    %c0_i32_1 = arith.constant 0 : i32
    return %c0_i32, %c0_i32_0 : i32, i32
  }
  func.func @transform_7(%arg0: i32, %arg1: i32) -> (i32, i32, i32) {
    %c0_i32 = arith.constant 0 : i32
    %c0_i32_0 = arith.constant 0 : i32
    return %arg0, %arg1, %c0_i32 : i32, i32, i32
  }
}

</mosaic_0001>

<bundles_post_ra>
// kernel: tpu_custom_call.1
= control target key start
LH: loop header
LB: loop body
LE: loop exit
PB: predicated region body
PF: predicated region fallthrough
CT: control target
= control target key end

     0   :  { %s2755_s0 = inlined_call_operand.hbm [shape: f32[2,8,32], index: 0, kind: input, shape index: {}]   ;;  %s2756_s1 = inlined_call_operand.hbm [shape: f32[2,8,32], index: 1, kind: input, shape index: {}]   ;;  %s2757_s2 = inlined_call_operand.hbm [shape: f32[32,32], index: 2, kind: input, shape index: {}]   ;;  %s2758_s3 = inlined_call_operand.hbm [shape: f32[32,32], index: 3, kind: input, shape index: {}]   ;;  %s2759_s4 = inlined_call_operand.hbm [shape: f32[32,32], index: 4, kind: input, shape index: {}]   ;;  %s2760_s5 = inlined_call_operand.hbm [shape: f32[4,8,32], index: 5, kind: input, shape index: {}]   ;;  %s2761_s6 = inlined_call_operand.vmem [shape: f32[1,32], index: 6, kind: input, shape index: {}]   ;;  %s2762_s7 = inlined_call_operand.hbm [shape: f32[2,8,32], index: 7, kind: output, shape index: {}]  }
   0x1   :  { %2764 = sst [smem:[#allocation20_spill]] %s2755_s0 }
   0x2   :  { %2765 = sst [smem:[#allocation21_spill]] %s2757_s2 }
   0x3   :  { %2766 = sst [smem:[#allocation22_spill]] %s2758_s3 }
   0x4   :  { %2767 = sst [smem:[#allocation23_spill]] %s2759_s4 }
   0x5   :  { %2768 = sst [smem:[#allocation24_spill]] %s2760_s5 }
   0x6   :  { %12 = vsyncpa [#allocation3], 0 }
   0x7   :  { %14 = vsyncpa [#allocation3 + $0x1], 0 }
   0x8   :  { %15 = vsyncpa [#allocation6], 0 }
   0x9   :  { %17 = vsyncpa [#allocation6 + $0x1], 0 }
   0xa   :  { %18 = vsyncpa [#allocation9], 0 }
   0xb   :  { %19 = vsyncpa [#allocation12], 0 }
   0xc   :  { %20 = vsyncpa [#allocation4], 0 }
   0xd   :  { %22 = vsyncpa [#allocation4 + $0x1], 0  ;;  %s2391_s24 = smov 0   ;;  %s2393_s25 = smov 0  }
   0xe   :  { %s2395_s26 = smov 0   ;;  %s2397_s27 = smov 0  }
   0xf   :  { %s2399_s28 = smov 0   ;;  %s2401_s29 = smov 0  }
  0x10 LB: > { %s2422_s30 = sadd.s32 4294967295, %s2335_s29   ;;  %p1774_p0 = scmp.ge.s32.totalorder %s2335_s29, 1  ;;  %s2335_s29 = sphi %s2401_s29, %s28_s29   ;;  %s2331_s28 = sphi %s2399_s28, %s2792_s28   ;;  %s2327_s27 = sphi %s2397_s27, %s2791_s27   ;;  %s2323_s26 = sphi %s2395_s26, %s2790_s26   ;;  %s2319_s25 = sphi %s2393_s25, %s2789_s25   ;;  %s2315_s24 = sphi %s2391_s24, %s2788_s24  }
  0x11   : > { %p2763_p1 = scmp.eq.s32.totalorder %s2422_s30, 0  ;;  %p232_p2 = scmp.lt.s32.totalorder %s2335_s29, 3 }
  0x12   : > { %s2337_s9 = smov [#allocation7]   ;;  %s2338_s12 = smov [#allocation8]  }
  0x13   : > { %p2427_p3 = pnand %p1774_p0, %p232_p2  ;;  %s244_s10 = sshll.u32 %s2337_s9, 4  ;;  %s245_s10 = int_to_ptr.vmem [resolvable:$true] %s244_s10 }
  0x14   : > { %s257_s13 = sshll.u32 %s2338_s12, 4  ;;  %s2339_s14 = smov [#allocation10]   ;;  %s258_s13 = int_to_ptr.vmem [resolvable:$true] %s257_s13 }
  0x15   : > { %p1970_p4 = pneg %p2427_p3  ;;  %s270_s15 = sshll.u32 %s2339_s14, 4  ;;  %s271_s15 = int_to_ptr.vmem [resolvable:$true] %s270_s15 }
  0x16   : > { %s2090_s16 = scalar_lea.vmem %s245_s10, 512  ;;  %p2098_p11 = scmp.lt.s32.totalorder %s245_s10, %s245_s10 }
  0x17   : > { %p2436_p6 = pnand %p1970_p4, %p2763_p1  ;;  %p2091_p8 = scmp.ne.s32.totalorder %s245_s10, %s2090_s16 }
  0x18   : > { %p2099_p12 = scmp.lt.s32.totalorder %s2090_s16, %s2090_s16 }
  0x19   : > { %p2081_p7 = pneg %p2436_p6 }
  0x1a   : > { %p2100_p13 = por %p2099_p12, %p2098_p11 }
  0x1b   : > { %p2093_p9 = pnand %p2091_p8, %p2081_p7 }
  0x1d   : > { %p2094_p10 = pneg %p2093_p9 }
  0x1f   : > { %p2101_p0 = pnand %p2100_p13, %p2094_p10 }
  0x21   : > { %2104 = shalt.err (!%p2101_p0)
}
  0x22   : > { %s2340_s17 = smov 128   ;;  %s2341_s18 = smov 8  }
  0x23   : > { %s2771_s2 = sld [smem:[#allocation21_spill]]  ;;  %s2116_s21 = scalar_lea.vmem %s258_s13, 512 }
  0x24   : > { %p2117_p2 = scmp.ne.s32.totalorder %s258_s13, %s2116_s21  ;;  %p2124_p9 = scmp.lt.s32.totalorder %s258_s13, %s258_s13 }
  0x25   : > { %p2125_p10 = scmp.lt.s32.totalorder %s2116_s21, %s2116_s21 }
  0x26   : > { %p2119_p4 = pnand %p2117_p2, %p2081_p7 }
  0x27   : > { %p2126_p11 = por %p2125_p10, %p2124_p9 }
  0x28   : > { %p2120_p8 = pneg %p2119_p4 }
  0x29   : > { %1973 = dma.hbm_to_vmem [thread:$0]  (!%p2436_p6), %s2771_s2, 512, %s245_s10, [#allocation6], %s2340_s17, %s2340_s17, %s2341_s18  }
  0x2a   : > { %p2127_p12 = pnand %p2126_p11, %p2120_p8 }
  0x2c   : > { %2130 = shalt.err (!%p2127_p12)
}
  0x2d   : > { %s2772_s3 = sld [smem:[#allocation22_spill]]  ;;  %s2142_s9 = scalar_lea.vmem %s271_s15, 512 }
  0x2e   : > { %p2143_p13 = scmp.ne.s32.totalorder %s271_s15, %s2142_s9  ;;  %p2150_p4 = scmp.lt.s32.totalorder %s271_s15, %s271_s15 }
  0x2f   : > { %p2151_p8 = scmp.lt.s32.totalorder %s2142_s9, %s2142_s9 }
  0x30   : > { %p2145_p0 = pnand %p2143_p13, %p2081_p7 }
  0x31   : > { %p2152_p9 = por %p2151_p8, %p2150_p4 }
  0x32   : > { %p2146_p2 = pneg %p2145_p0 }
  0x33   : > { %1976 = dma.hbm_to_vmem [thread:$0]  (!%p2436_p6), %s2772_s3, 512, %s258_s13, [#allocation9], %s2340_s17, %s2340_s17, %s2341_s18  }
  0x34   : > { %p2153_p10 = pnand %p2152_p9, %p2146_p2 }
  0x36   : > { %2156 = shalt.err (!%p2153_p10)
}
  0x37   : > { %s2773_s4 = sld [smem:[#allocation23_spill]]  ;;  %s2342_s13 = smov [#allocation11]  }
  0x38   : > { %s283_s14 = sshll.u32 %s2342_s13, 4  ;;  %s284_s14 = int_to_ptr.vmem [resolvable:$true] %s283_s14 }
  0x39   : > { %s2168_s16 = scalar_lea.vmem %s284_s14, 512  ;;  %p2176_p0 = scmp.lt.s32.totalorder %s284_s14, %s284_s14 }
  0x3a   : > { %p2169_p11 = scmp.ne.s32.totalorder %s284_s14, %s2168_s16  ;;  %p2177_p2 = scmp.lt.s32.totalorder %s2168_s16, %s2168_s16 }
  0x3c   : > { %p2171_p12 = pnand %p2169_p11, %p2081_p7  ;;  %p2178_p4 = por %p2177_p2, %p2176_p0 }
  0x3d   : > { %1979 = dma.hbm_to_vmem [thread:$0]  (!%p2436_p6), %s2773_s4, 512, %s271_s15, [#allocation9], %s2340_s17, %s2340_s17, %s2341_s18  }
  0x3e   : > { %p2172_p13 = pneg %p2171_p12 }
  0x40   : > { %p2179_p8 = pnand %p2178_p4, %p2172_p13 }
  0x42   : > { %2182 = shalt.err (!%p2179_p8)
}
  0x43   : > { %s2774_s5 = sld [smem:[#allocation24_spill]]  ;;  %s1773_s11 = sadd.s32 4294967294, %s2335_s29  }
  0x44   : > { %s40_s20 = sadd.s32 1, %s2331_s28  ;;  %s49_s21 = sadd.s32 1, %s2323_s26 }
  0x45   : > { %p42_p7 = scmp.ge.s32.totalorder %s40_s20, 2  ;;  %p56_p9 = scmp.ne.s32.totalorder %s2323_s26, %s2319_s25 }
  0x46   : > { %p57_p10 = scmp.eq.s32.totalorder %s2335_s29, 0  ;;  %p62_p12 = scmp.ne.s32.totalorder %s2319_s25, %s2315_s24 }
  0x47   : > { %s2794_s20 = smov (%p42_p7, %s40_s20), 0  ;;  %p225_p4 = scmp.eq.s32.totalorder %s1773_s11, 1 }
  0x48   : > { %p2494_p11 = por %p57_p10, %p56_p9  ;;  %p2505_p0 = por %p2763_p1, %p62_p12 }
  0x49   : > { %1982 = dma.hbm_to_vmem [thread:$0]  (!%p2436_p6), %s2774_s5, 512, %s284_s14, [#allocation12], %s2340_s17, %s2340_s17, %s2341_s18  }
  0x4a   : > { %s44_s17 = ssub.s32 %s2331_s28, %s2794_s20  ;;  %p219_p6 = scmp.eq.s32.totalorder %s2422_s30, 1 }
  0x4b   : > { %p47_p13 = scmp.eq.s32.totalorder %s44_s17, 0  ;;  %p2516_p8 = por %p225_p4, %p62_p12 }
  0x4c   : > { %p2509_p2 = por %p219_p6, %p56_p9  ;;  %p1998_p7 = scmp.lt.s32.totalorder %s2335_s29, 2 }
  0x4d   : > { %s2514_s9 = scalar_select %p47_p13, %s2323_s26, %s49_s21  }
  0x4e   : > { %s300_s12 = sand.u32 1, %s2323_s26   ;;  %s1781_s13 = sshll.u32 %s2331_s28, 7 }
  0x4f   : > { %s1780_s14 = sshll.u32 %s300_s12, 3  ;;  %s2779_s0 = sld [smem:[#allocation20_spill]] }
  0x50   : > { %s304_s17 = scalar_lea.vmem [#allocation2], %s1780_s14  ;;  %p2528_p9 = pnand %p1998_p7, %p2494_p11 }
  0x51   : > { %s312_s2 = sshll.u32 %s304_s17, 4  ;;  %s2535_s4 = scalar_lea.hbm %s2756_s1, %s1781_s13  ;;  %s313_s2 = int_to_ptr.vmem [resolvable:$true] %s312_s2 }
  0x52   : > { %s301_s5 = scalar_lea.sflag [#allocation3], %s300_s12  ;;  %p2185_p10 = pneg %p2528_p9 }
  0x53   : > { %s2196_s16 = scalar_lea.vmem %s313_s2, 128  ;;  %s2343_s22 = smov [#allocation2]  }
  0x54   : > { %p2197_p12 = scmp.ne.s32.totalorder %s313_s2, %s2196_s16  ;;  %s2201_s15 = sshll.u32 %s2343_s22, 4  ;;  %s2202_s15 = int_to_ptr.vmem [resolvable:$false] %s2201_s15 }
  0x55   : > { %s310_s19 = scalar_lea.hbm %s2779_s0, %s1781_s13  ;;  %s2203_s17 = scalar_lea.vmem %s2202_s15, 256 }
  0x56   : > { %p2199_p6 = pnand %p2197_p12, %p2185_p10  ;;  %p2204_p13 = scmp.lt.s32.totalorder %s313_s2, %s2202_s15 }
  0x57   : > { %p2205_p4 = scmp.lt.s32.totalorder %s2203_s17, %s2196_s16 }
  0x58   : > { %p2200_p11 = pneg %p2199_p6 }
  0x59   : > { %p2206_p7 = por %p2205_p4, %p2204_p13 }
  0x5b   : > { %p2207_p5 = pnand %p2206_p7, %p2200_p11 }
  0x5d   : > { %2210 = shalt.err (!%p2207_p5)
}
  0x5e   : > { %1986 = dma.hbm_to_vmem [thread:$0]  (!%p2528_p9), %s310_s19, 128, %s313_s2, %s301_s5  }
  0x5f   : > { %s319_s12 = sand.u32 1, %s2335_s29   ;;  %s323_s13 = scalar_lea.vmem [#allocation5], %s1780_s14 }
  0x60   : > { %s330_s11 = sshll.u32 %s323_s13, 4  ;;  %s320_s21 = scalar_lea.sflag [#allocation6], %s319_s12  ;;  %s331_s11 = int_to_ptr.vmem [resolvable:$true] %s330_s11 }
  0x61   : > { %s2224_s0 = scalar_lea.vmem %s331_s11, 128  ;;  %s2344_s16 = smov [#allocation5]  }
  0x62   : > { %p2225_p12 = scmp.ne.s32.totalorder %s331_s11, %s2224_s0  ;;  %s2229_s22 = sshll.u32 %s2344_s16, 4  ;;  %s2230_s22 = int_to_ptr.vmem [resolvable:$false] %s2229_s22 }
  0x63   : > { %s2231_s15 = scalar_lea.vmem %s2230_s22, 256  ;;  %p2232_p5 = scmp.lt.s32.totalorder %s331_s11, %s2230_s22 }
  0x64   : > { %p2227_p6 = pnand %p2225_p12, %p2185_p10  ;;  %p2233_p11 = scmp.lt.s32.totalorder %s2231_s15, %s2224_s0 }
  0x66   : > { %p2228_p1 = pneg %p2227_p6  ;;  %p2234_p13 = por %p2233_p11, %p2232_p5 }
  0x68   : > { %p2235_p4 = pnand %p2234_p13, %p2228_p1 }
  0x6a   : > { %2238 = shalt.err (!%p2235_p4)
}
  0x6b   : > { %1989 = dma.hbm_to_vmem [thread:$0]  (!%p2528_p9), %s2535_s4, 128, %s331_s11, %s320_s21  }
  0x6c   : > { %339 = sbr.rel (%p2427_p3) target bundleno = 2570 (0xa0a), region = 48  ;;  %s2554_s2 = sand.u32 (!%p2427_p3), 1, %s2319_s25  }
  0x6d   : > { %s2557_s5 = sshll.u32 (!%p2427_p3), %s2554_s2, 3  ;;  %s342_s0 = scalar_lea.sflag (!%p2427_p3), [#allocation3], %s2554_s2 }
  0x6e   : > { %s345_s14 = scalar_lea.vmem (!%p2427_p3), [#allocation2], %s2557_s5 }
  0x71   : > { %2290 = dma.done.wait (%p2505_p0), %s342_s0, 128  }
  0x72   : > { %2292 = vsyncadd (%p2505_p0), %s342_s0, 4294967168  ;;  %s350_s3 = sand.u32 1, %s2422_s30   ;;  %s354_s8 = scalar_lea.vmem [#allocation5], %s2557_s5 }
  0x73   : > { %s351_s4 = scalar_lea.sflag [#allocation6], %s350_s3 }
  0x74   : > { %2294 = dma.done.wait (%p2505_p0), %s351_s4, 128  }
  0x75   : > { %2296 = vsyncadd (%p2505_p0), %s351_s4, 4294967168  ;;  %p2781_p1 = scmp.eq.s32.totalorder %s2422_s30, 0 }
  0x77   : > { %2298 = dma.done.wait (%p2781_p1), [#allocation6], 512   ;;  %p2782_p3 = pmov %p2781_p1 }
  0x78   : > { %p2783_p9 = pmov %p2781_p1 }
  0x79   : > { %2300 = vsyncadd (%p2782_p3), [#allocation6], 4294966784 }
  0x7a   : > { %2302 = dma.done.wait (%p2783_p9), [#allocation9], 1024   ;;  %p2784_p10 = pmov %p2781_p1 }
  0x7b   : > { %p2785_p7 = pmov %p2781_p1 }
  0x7c   : > { %2304 = vsyncadd (%p2784_p10), [#allocation9], 4294966272 }
  0x7d   : > { %2306 = dma.done.wait (%p2785_p7), [#allocation12], 512   ;;  %p2786_p12 = pmov %p2781_p1 }
  0x7e   : > { %v2345_v0 = vmov 0.0   ;;  %vm2346_vm0 = vmmov 0   ;;  %v489_v1 = vld [vmem:[#allocation8 + $0x18] sm:$0xff]  ;;  %v488_v3 = vld [vmem:[#allocation8 + $0x10] sm:$0xff]  ;;  %v487_v5 = vld [vmem:[#allocation8 + $0x8] sm:$0xff]  ;;  %vm412_vm1 = vcmask 261120   ;;  %v638_v23 = vlaneseq }
  0x7f   : > { %2308 = vsyncadd (%p2786_p12), [#allocation12], 4294966784  ;;  %1866 = vmatprep.subr.mxu1 %v2345_v0  ;;  %1855 = vmatprep.subr.mxu0 %v2345_v0  ;;  %v411_v2 = vld [vmem:[#allocation7 + $0x18] sm:$0xff]  ;;  %v410_v4 = vld [vmem:[#allocation7 + $0x10] sm:$0xff]  ;;  %vm645_vm2 = vcmask 64512   ;;  %s2347_s30 = smov 120  }
  0x80   : > { %1874 = vmatprep.mubr.msk.f32.mxu1 %vm2346_vm0, %v2345_v0  ;;  %1863 = vmatprep.mubr.msk.f32.mxu0 %vm2346_vm0, %v2345_v0  ;;  %v409_v6 = vld [vmem:[#allocation7 + $0x8] sm:$0xff]  ;;  %v486_v7 = vld [vmem:[#allocation8] sm:$0xff]  ;;  %v407_v9 = vld [vmem:[%s354_s8] sm:$0xff]  ;;  %v2638_v24 = vshrl.u32 %v638_v23, 7  ;;  %v2640_v25 = vand.u32 127, %v638_v23  ;;  %s2348_s18 = smov 112  }
  0x81   : > { %1867 = vmatpush3.msra.mxu1 %v489_v1  ;;  %1856 = vmatpush3.msra.mxu0 %v411_v2  ;;  %v408_v8 = vld [vmem:[#allocation7] sm:$0xff]  ;;  %v566_v11 = vld [vmem:[#allocation10 + $0x18] sm:$0xff]  ;;  %v565_v12 = vld [vmem:[#allocation10 + $0x10] sm:$0xff]  ;;  %s2349_s19 = smov 104   ;;  %s1813_s13 = sshll.u32 %s2327_s27, 7 }
  0x82   : > { %1868 = vmatprep.subr.mxu1 %v2345_v0  ;;  %1857 = vmatprep.subr.mxu0 %v2345_v0  ;;  %v406_v10 = vld [vmem:[%s345_s14] sm:$0xff]  ;;  %vm644_vm3 = vcmp.le.s32.totalorder %v2640_v25, %v2638_v24  ;;  %s405_s11 = scalar_lea.vmem [#allocation13], %s2557_s5  ;;  %s1629_s15 = scalar_lea.hbm %s2762_s7, %s1813_s13 }
  0x83   : > { %1869 = vmatpush3.msra.mxu1 %v488_v3  ;;  %1858 = vmatpush3.msra.mxu0 %v410_v4  ;;  %v564_v13 = vld [vmem:[#allocation10 + $0x8] sm:$0xff]  ;;  %v563_v14 = vld [vmem:[#allocation10] sm:$0xff]  ;;  %s1631_s21 = sshll.u32 %s405_s11, 4  ;;  %s1617_s0 = scalar_lea.sflag [#allocation4], %s2554_s2  ;;  %s1632_s21 = int_to_ptr.vmem [resolvable:$true] %s1631_s21 }
  0x84   : > { %1870 = vmatprep.subr.mxu1 %v2345_v0  ;;  %1859 = vmatprep.subr.mxu0 %v2345_v0  ;;  %v976_v47 = vld [vmem:[#allocation11 + $0x8] sm:$0xff]  ;;  %v807_v52 = vld [vmem:[#allocation11] sm:$0xff]  ;;  %s2239_s14 = scalar_lea.vmem %s1632_s21, 128  ;;  %s2350_s3 = smov [#allocation13]  }
  0x85   : > { %1871 = vmatpush3.msra.mxu1 %v487_v5  ;;  %1860 = vmatpush3.msra.mxu0 %v409_v6  ;;  %p2240_p0 = scmp.ne.s32.totalorder %s1632_s21, %s2239_s14  ;;  %s2243_s27 = sshll.u32 %s2350_s3, 4  ;;  %s2244_s27 = int_to_ptr.vmem [resolvable:$false] %s2243_s27 }
  0x86   : > { %1872 = vmatprep.subr.mxu1 %v2345_v0  ;;  %1861 = vmatprep.subr.mxu0 %v2345_v0  ;;  %s2245_s5 = scalar_lea.vmem %s2244_s27, 256  ;;  %p2246_p11 = scmp.lt.s32.totalorder %s1632_s21, %s2244_s27 }
  0x87   : > { %1873 = vmatpush3.msra.mxu1 %v486_v7  ;;  %1862 = vmatpush3.msra.mxu0 %v408_v8  ;;  %p2241_p6 = pnand %p2240_p0, %p2509_p2  ;;  %p2247_p13 = scmp.lt.s32.totalorder %s2245_s5, %s2239_s14 }
  0x88   : > { %1875 = vmatmul.mubr.msk.f32.vlgmr.msra.gmra.mxu1 %vm412_vm1, %v407_v9  ;;  %1864 = vmatmul.mubr.msk.f32.vlgmr.msra.gmra.mxu0 %vm412_vm1, %v406_v10 }
  0x89   : > { %1888 = vmatprep.subr.mxu1 %v2345_v0  ;;  %1890 = vmatprep.mubr.msk.f32.mxu1 %vm2346_vm0, %v2345_v0  ;;  %p2242_p5 = pneg %p2241_p6  ;;  %p2248_p4 = por %p2247_p13, %p2246_p11 }
  0x8a   : > { %1877 = vmatprep.subr.mxu0 %v2345_v0  ;;  %1885 = vmatprep.mubr.msk.f32.mxu0 %vm2346_vm0, %v2345_v0 }
  0x8b   : > { %1878 = vmatpush3.msra.mxu0 %v566_v11  ;;  %p2249_p1 = pnand %p2248_p4, %p2242_p5 }
  0x8c   : > { %1879 = vmatprep.subr.mxu0 %v2345_v0 }
  0x8d   : > { %1880 = vmatpush3.msra.mxu0 %v565_v12 }
  0x8e   : > { %1881 = vmatprep.subr.mxu0 %v2345_v0 }
  0x8f   : > { %1882 = vmatpush3.msra.mxu0 %v564_v13 }
  0x90   : > { %1883 = vmatprep.subr.mxu0 %v2345_v0 }
  0x91   : > { %1884 = vmatpush3.msra.mxu0 %v563_v14 }
  0x92   : > { %1886 = vmatmul.mubr.msk.f32.vlgmr.msra.gmra.mxu0 %vm412_vm1, %v407_v9  ;;  %1898 = vmatprep.subr.mxu0 %v2345_v0 }
  0x93   : > { %1900 = vmatprep.mubr.msk.f32.mxu0 %vm2346_vm0, %v2345_v0 }
 0x148   : > { %v2614_v15 = vpop.f32.mrf.mxu1  ;;  %v2616_v16 = vpop.f32.mrf.mxu0 }
 0x149   : > { %810 = vrot.lane.b32.xlu0 %v2614_v15, %s2347_s30  ;;  %1889 = vmatpush3.xpose.msk.msra.mxu1 %vm645_vm2, %v2614_v15 }
 0x14a   : > { %v1876_v17 = vpop.f32.mrf.mxu1  ;;  %v1865_v18 = vpop.f32.mrf.mxu0  ;;  %1893 = vmatprep.subr.mxu1 %v2345_v0 }
 0x14c   : > { %1891 = vmatmul.mubr.msk.f32.vlgmr.msra.gmra.mxu1 %vm645_vm2, %v2616_v16 }
 0x14d   : > { %808 = vrot.lane.b32.xlu0 %v2616_v16, %s2347_s30  ;;  %1895 = vmatprep.mubr.msk.f32.mxu1 %vm2346_vm0, %v2345_v0 }
 0x152   : > { %v2629_v19 = vpop.f32.mrf.mxu0 }
 0x153   : > { %1894 = vmatpush3.msra.mxu1 %v2629_v19 }
 0x154   : > { %v1887_v20 = vpop.f32.mrf.mxu0  ;;  %1903 = vmatprep.subr.mxu1 %v2345_v0 }
 0x1bb   : > { %v811_v21 = vpop.permute.xlu0 %810 }
 0x1bc   : > { %1899 = vmatpush3.xpose.msk.msra.mxu0 %vm645_vm2, %v811_v21 }
 0x1bd   : > { %1908 = vmatprep.subr.mxu0 %v2345_v0 }
 0x1bf   : > { %v809_v22 = vpop.permute.xlu0 %808 }
 0x1c0   : > { %1901 = vmatmul.mubr.msk.f32.vlgmr.msra.gmra.mxu0 %vm645_vm2, %v809_v22 }
 0x1c1   : > { %1910 = vmatprep.mubr.msk.f32.mxu0 %vm2346_vm0, %v2345_v0  ;;  %1909 = vmatpush3.msra.mxu0 %v976_v47 }
 0x1c2   : > { %1918 = vmatprep.subr.mxu0 %v2345_v0 }
 0x20c   : > { %v718_v26 = vpop.f32.mrf.mxu1 }
 0x20d   : > { %v722_v27 = vsel %vm644_vm3, %v718_v26, -inf }
 0x20e   : > { %v1892_v28 = vpop.f32.mrf.mxu1  ;;  %v723_v29 = vsel %vm645_vm2, %v722_v27, -inf }
 0x20f   : > { %724 = vmax.xlane.f32.xlu1 %v723_v29 }
 0x280   : > { %v882_v30 = vpop.f32.mrf.mxu0 }
 0x281   : > { %v886_v31 = vsel %vm644_vm3, %v882_v30, -inf }
 0x282   : > { %v1902_v32 = vpop.f32.mrf.mxu0  ;;  %v887_v33 = vsel %vm645_vm2, %v886_v31, -inf }
 0x283   : > { %888 = vmax.xlane.f32.xlu1 %v887_v33 }
 0x298   : > { %v725_v34 = vpop.xlane.xlu1 %724 }
 0x299   : > { %v726_v35 = vsub.f32 %v722_v27, %v725_v34 }
 0x29b   : > { %v727_v36 = vmul.f32 1.442695, %v726_v35 }
 0x29d   : > { %2063 = vpow2.f32 %v727_v36 }
 0x2aa   : > { %v2064_v37 = vpop.eup %2063 }
 0x2ab   : > { %v729_v38 = vsel %vm645_vm2, %v2064_v37, 0.0 }
 0x2ac   : > { %730 = vadd.xlane.f32.xlu0 %v729_v38  ;;  %v1811_v38 = vld [vmem:[%s2761_s6] ss:$0 sm:$0xff] }
 0x2c2   : > { %1213 = vrot.lane.b32.xlu0 %v2629_v19, %s2348_s18 }
 0x30c   : > { %v889_v39 = vpop.xlane.xlu1 %888 }
 0x30d   : > { %v890_v40 = vsub.f32 %v886_v31, %v889_v39 }
 0x30f   : > { %v891_v41 = vmul.f32 1.442695, %v890_v40 }
 0x311   : > { %2065 = vpow2.f32 %v891_v41 }
 0x31e   : > { %v2066_v42 = vpop.eup %2065 }
 0x31f   : > { %v893_v43 = vsel %vm645_vm2, %v2066_v42, 0.0 }
 0x320   : > { %894 = vadd.xlane.f32.xlu1 %v893_v43 }
 0x331   : > { %899 = vrot.lane.b32.xlu1 %v2629_v19, %s2347_s30 }
 0x335   : > { %v731_v44 = vpop.xlane.xlu0 %730  ;;  %1125 = vrot.lane.b32.xlu1 %v2614_v15, %s2348_s18 }
 0x336   : > { %2067 = vrcp.f32 %v731_v44 }
 0x339   : > { %1123 = vrot.lane.b32.xlu1 %v2616_v16, %s2348_s18  ;;  %v1214_v54 = vpop.permute.xlu0 %1213 }
 0x343   : > { %v2068_v45 = vpop.eup %2067 }
 0x344   : > { %v733_v46 = vmul.f32 %v2068_v45, %v2064_v37 }
 0x346   : > { %1896 = vmatmul.mubr.msk.f32.vlgmr.msra.gmra.mxu1 %vm645_vm2, %v733_v46 }
 0x347   : > { %1905 = vmatprep.mubr.msk.f32.mxu1 %vm2346_vm0, %v2345_v0 }
 0x3a9   : > { %v895_v48 = vpop.xlane.xlu1 %894 }
 0x3aa   : > { %2069 = vrcp.f32 %v895_v48 }
 0x3ad   : > { %v900_v49 = vpop.permute.xlu1 %899 }
 0x3ae   : > { %1904 = vmatpush3.msra.mxu1 %v900_v49 }
 0x3af   : > { %1913 = vmatprep.subr.mxu1 %v2345_v0 }
 0x3b1   : > { %v1126_v56 = vpop.permute.xlu1 %1125 }
 0x3b5   : > { %v1124_v59 = vpop.permute.xlu1 %1123 }
 0x3b7   : > { %v2070_v50 = vpop.eup %2069 }
 0x3b8   : > { %v897_v51 = vmul.f32 %v2070_v50, %v2066_v42 }
 0x3ba   : > { %1906 = vmatmul.mubr.msk.f32.vlgmr.msra.gmra.mxu1 %vm645_vm2, %v897_v51 }
 0x3bb   : > { %1914 = vmatpush3.msra.mxu1 %v807_v52  ;;  %1915 = vmatprep.mubr.msk.f32.mxu1 %vm2346_vm0, %v2345_v0 }
 0x3bc   : > { %1923 = vmatprep.subr.mxu1 %v2345_v0 }
 0x406   : > { %v803_v53 = vpop.f32.mrf.mxu1 }
 0x407   : > { %1916 = vmatmul.mubr.msk.f32.vlgmr.msra.gmra.mxu1 %vm645_vm2, %v803_v53 }
 0x408   : > { %1924 = vmatpush3.msra.mxu1 %v1214_v54  ;;  %v1897_v55 = vpop.f32.mrf.mxu1  ;;  %1925 = vmatprep.mubr.msk.f32.mxu1 %vm2346_vm0, %v2345_v0 }
 0x409   : > { %1933 = vmatprep.subr.mxu1 %v2345_v0 }
 0x47a   : > { %v971_v57 = vpop.f32.mrf.mxu1 }
 0x47b   : > { %1911 = vmatmul.mubr.msk.f32.vlgmr.msra.gmra.mxu0 %vm645_vm2, %v971_v57 }
 0x47c   : > { %1919 = vmatpush3.xpose.msk.msra.mxu0 %vm645_vm2, %v1126_v56  ;;  %v1907_v58 = vpop.f32.mrf.mxu1  ;;  %1920 = vmatprep.mubr.msk.f32.mxu0 %vm2346_vm0, %v2345_v0 }
 0x47d   : > { %1928 = vmatprep.subr.mxu0 %v2345_v0 }
 0x47f   : > { %1921 = vmatmul.mubr.msk.f32.vlgmr.msra.gmra.mxu0 %vm645_vm2, %v1124_v59 }
 0x480   : > { %1930 = vmatprep.mubr.msk.f32.mxu0 %vm2346_vm0, %v2345_v0 }
 0x4c7   : > { %v1119_v60 = vpop.f32.mrf.mxu1 }
 0x4c9   : > { %v1917_v61 = vpop.f32.mrf.mxu1 }
 0x53b   : > { %v1046_v62 = vpop.f32.mrf.mxu0 }
 0x53c   : > { %v1120_v30 = vadd.f32 %v1119_v60, %v1046_v62 }
 0x53d   : > { %v1912_v63 = vpop.f32.mrf.mxu0 }
 0x53f   : > { %v1197_v1 = vpop.f32.mrf.mxu0 }
 0x540   : > { %v1201_v2 = vsel %vm644_vm3, %v1197_v1, -inf }
 0x541   : > { %v1922_v3 = vpop.f32.mrf.mxu0  ;;  %v1202_v4 = vsel %vm645_vm2, %v1201_v2, -inf }
 0x542   : > { %1203 = vmax.xlane.f32.xlu1 %v1202_v4 }
 0x5cb   : > { %v1204_v5 = vpop.xlane.xlu1 %1203 }
 0x5cc   : > { %v1205_v6 = vsub.f32 %v1201_v2, %v1204_v5 }
 0x5ce   : > { %v1206_v7 = vmul.f32 1.442695, %v1205_v6 }
 0x5d0   : > { %2071 = vpow2.f32 %v1206_v7 }
 0x5dd   : > { %v2072_v8 = vpop.eup %2071 }
 0x5de   : > { %v1208_v9 = vsel %vm645_vm2, %v2072_v8, 0.0 }
 0x5df   : > { %1209 = vadd.xlane.f32.xlu0 %v1208_v9 }
 0x5f5   : > { %1367 = vrot.lane.b32.xlu0 %v2614_v15, %s2349_s19  ;;  %v1290_v15 = vld [vmem:[#allocation11 + $0x10] sm:$0xff] }
 0x5f6   : > { %1929 = vmatpush3.msra.mxu0 %v1290_v15 }
 0x5f7   : > { %1938 = vmatprep.subr.mxu0 %v2345_v0 }
 0x5f9   : > { %1365 = vrot.lane.b32.xlu0 %v2616_v16, %s2349_s19 }
 0x668   : > { %v1210_v10 = vpop.xlane.xlu0 %1209 }
 0x669   : > { %2073 = vrcp.f32 %v1210_v10 }
 0x66c   : > { %v1368_v12 = vpop.permute.xlu0 %1367 }
 0x670   : > { %v1366_v14 = vpop.permute.xlu0 %1365 }
 0x676   : > { %v2074_v11 = vpop.eup %2073 }
 0x677   : > { %v1212_v13 = vmul.f32 %v2074_v11, %v2072_v8 }
 0x679   : > { %1926 = vmatmul.mubr.msk.f32.vlgmr.msra.gmra.mxu1 %vm645_vm2, %v1212_v13 }
 0x67a   : > { %1934 = vmatpush3.xpose.msk.msra.mxu1 %vm645_vm2, %v1368_v12  ;;  %1935 = vmatprep.mubr.msk.f32.mxu1 %vm2346_vm0, %v2345_v0 }
 0x67b   : > { %1943 = vmatprep.subr.mxu1 %v2345_v0 }
 0x67d   : > { %1936 = vmatmul.mubr.msk.f32.vlgmr.msra.gmra.mxu1 %vm645_vm2, %v1366_v14 }
 0x67e   : > { %1945 = vmatprep.mubr.msk.f32.mxu1 %vm2346_vm0, %v2345_v0 }
 0x739   : > { %v1285_v16 = vpop.f32.mrf.mxu1 }
 0x73a   : > { %1931 = vmatmul.mubr.msk.f32.vlgmr.msra.gmra.mxu0 %vm645_vm2, %v1285_v16 }
 0x73b   : > { %v1927_v17 = vpop.f32.mrf.mxu1  ;;  %1940 = vmatprep.mubr.msk.f32.mxu0 %vm2346_vm0, %v2345_v0  ;;  %v1532_v0 = vld [vmem:[#allocation11 + $0x18] sm:$0xff] }
 0x73c   : > { %1944 = vmatpush3.msra.mxu1 %v1532_v0 }
 0x73d   : > { %v1439_v18 = vpop.f32.mrf.mxu1 }
 0x73e   : > { %v1443_v20 = vsel %vm644_vm3, %v1439_v18, -inf }
 0x73f   : > { %v1937_v21 = vpop.f32.mrf.mxu1  ;;  %v1444_v22 = vsel %vm645_vm2, %v1443_v20, -inf }
 0x740   : > { %1445 = vmax.xlane.f32.xlu0 %v1444_v22 }
 0x7c9   : > { %v1446_v23 = vpop.xlane.xlu0 %1445 }
 0x7ca   : > { %v1447_v26 = vsub.f32 %v1443_v20, %v1446_v23 }
 0x7cc   : > { %v1448_v27 = vmul.f32 1.442695, %v1447_v26 }
 0x7ce   : > { %2075 = vpow2.f32 %v1448_v27 }
 0x7db   : > { %v2076_v28 = vpop.eup %2075 }
 0x7dc   : > { %v1450_v29 = vsel %vm645_vm2, %v2076_v28, 0.0 }
 0x7dd   : > { %1451 = vadd.xlane.f32.xlu1 %v1450_v29 }
 0x7ee   : > { %1455 = vrot.lane.b32.xlu1 %v2629_v19, %s2349_s19 }
 0x7fa   : > { %v1360_v24 = vpop.f32.mrf.mxu0 }
 0x7fb   : > { %v1364_v25 = vadd.f32 %v1360_v24, %v1120_v30 }
 0x7fc   : > { %v1932_v31 = vpop.f32.mrf.mxu0 }
 0x866   : > { %v1452_v32 = vpop.xlane.xlu1 %1451 }
 0x867   : > { %2077 = vrcp.f32 %v1452_v32 }
 0x86a   : > { %v1456_v33 = vpop.permute.xlu1 %1455 }
 0x86b   : > { %1939 = vmatpush3.msra.mxu0 %v1456_v33 }
 0x874   : > { %v2078_v34 = vpop.eup %2077 }
 0x875   : > { %v1454_v35 = vmul.f32 %v2078_v34, %v2076_v28 }
 0x877   : > { %1941 = vmatmul.mubr.msk.f32.vlgmr.msra.gmra.mxu0 %vm645_vm2, %v1454_v35 }
 0x937   : > { %v1527_v36 = vpop.f32.mrf.mxu0 }
 0x938   : > { %1946 = vmatmul.mubr.msk.f32.vlgmr.msra.gmra.mxu1 %vm645_vm2, %v1527_v36 }
 0x939   : > { %v1942_v19 = vpop.f32.mrf.mxu0 }
 0x9f8   : > { %v1602_v37 = vpop.f32.mrf.mxu1 }
 0x9f9   : > { %v1606_v39 = vadd.f32 %v1602_v37, %v1364_v25 }
 0x9fa   : > { %v1947_v40 = vpop.f32.mrf.mxu1 }
 0x9fb   : > { %v1614_v41 = vadd.f32 %v1811_v38, %v1606_v39 }
 0x9fd   : > { %1615 = vst.msk [vmem:[%s405_s11] sm:$0xff] %vm412_vm1, %v1614_v41 }
 0x9fe   : > { %2252 = shalt.err (!%p2249_p1)
}
 0x9ff   : > { %s2253_s4 = scalar_lea.hbm %s1629_s15, 128  ;;  %s2257_s30 = scalar_lea.hbm %s2762_s7, 256 }
 0xa00   : > { %p2254_p3 = scmp.ne.s32.totalorder %s1629_s15, %s2253_s4  ;;  %p2258_p7 = scmp.lt.s32.totalorder %s1629_s15, %s2762_s7 }
 0xa01   : > { %p2259_p12 = scmp.lt.s32.totalorder %s2257_s30, %s2253_s4 }
 0xa02   : > { %p2255_p9 = pnand %p2254_p3, %p2509_p2 }
 0xa03   : > { %p2260_p0 = por %p2259_p12, %p2258_p7 }
 0xa04   : > { %p2256_p10 = pneg %p2255_p9 }
 0xa06   : > { %p2261_p6 = pnand %p2260_p0, %p2256_p10 }
 0xa08   : > { %2264 = shalt.err (!%p2261_p6)
}
 0xa09   : > { %1968 = dma.vmem_to_hbm [thread:$0]  (%p2509_p2), %s1632_s21, 128, %s1629_s15, %s1617_s0  }
 0xa0a PF: > { %s1643_s17 = sand.u32 1, %s2315_s24   ;;  %p2787_p5 = scmp.ge.s32.totalorder %s2335_s29, 2 }
 0xa0b   : > { %s1644_s12 = scalar_lea.sflag [#allocation4], %s1643_s17 }
 0xa0c   : > { %p1991_p11 = pnand %p2787_p5, %p2516_p8 }
 0xa0e   : > { %p1992_p13 = pneg %p1991_p11 }
 0xa10   : > { %2310 = dma.done.wait (%p1992_p13), %s1644_s12, 128  }
 0xa11   : > { %2312 = vsyncadd (%p1992_p13), %s1644_s12, 4294967168  ;;  %s28_s29 = sadd.s32 1, %s2335_s29   ;;  %s2788_s24 = smov %s2319_s25 }
 0xa12   : > { %p25_p4 = scmp.ge.s32.totalorder %s28_s29, 4   ;;  %s2789_s25 = smov %s2323_s26 }
 0xa13   : > { %s2790_s26 = smov %s2514_s9  ;;  %s2791_s27 = smov %s2331_s28 }
 0xa14   : > { %s2792_s28 = smov %s2794_s20  ;;  %27 = sbr.rel (!%p25_p4) target bundleno = 16 (0x10), region = 125 }
 0xa19   :  { %1649 = vsyncpa [#allocation3], 1 }
 0xa1a   :  { %1651 = vsyncpa [#allocation3 + $0x1], 1 }
 0xa1b   :  { %1652 = vsyncpa [#allocation6], 1 }
 0xa1c   :  { %1654 = vsyncpa [#allocation6 + $0x1], 1 }
 0xa1d   :  { %1655 = vsyncpa [#allocation9], 1 }
 0xa1e   :  { %1656 = vsyncpa [#allocation12], 1 }
 0xa1f   :  { %1657 = vsyncpa [#allocation4], 1 }
 0xa20   :  { %1659 = vsyncpa [#allocation4 + $0x1], 1 }

</bundles_post_ra>
